<compile_context>
chip_gen: v6e
topology: v6e:2x2x1
jax: 0.10.0
libtpu: 0.0.40
codegen_flags: <defaults>
</compile_context>

<pallas_src>
import functools
import math

import numpy as np

import jax
import jax.numpy as jnp
from jax.experimental import pallas as pl
from jax.experimental.pallas import tpu as pltpu


_LANE = 128
_SUBLANE = 8
# Per-step output block budget.  8 MiB double-buffered = 16 MiB of VMEM,
# comfortably inside the default scoped limit on v5e/v6e/v7x.
_TILE_BYTES = 8 * 1024 * 1024


def _cdiv(a: int, b: int) -> int:
    return -(-a // b)


def _pe_kernel(div_ref, off_ref, o_ref, *, pack: int):
    """One (TR, W) tile of the packed sinusoidal table.

    div_ref, off_ref: (1, W) f32, broadcast over rows.
        div_ref[0, l] = exp(-(2 * floor((l % d) / 2)) * ln(10000) / d)
        off_ref[0, l] = (l // d) * div_ref[0, l] + (pi/2 if (l % d) is odd)
    Output element (r, l) of grid step i:
        pos   = ((i*TR + r) * pack) + (l // d)
        angle = pos * div_term(l % d) + phase(l % d)
        out   = sin(angle)            # cos(x) == sin(x + pi/2)
    """
    tr, w = o_ref.shape
    row0 = pl.program_id(0) * tr
    # Exact integer base position of each slab row (pos_base = slab_row * pack).
    base = (
        (row0 + jax.lax.broadcasted_iota(jnp.int32, (tr, w), 0)) * pack
    ).astype(jnp.float32)
    angle = base * div_ref[...] + off_ref[...]
    o_ref[...] = jnp.sin(angle).astype(o_ref.dtype)


def build_encoding(max_size: int, d_model: int, dtype=jnp.float32) -> jax.Array:
    """Compute the (max_size, d_model) sinusoidal encoding table with Pallas."""
    assert max_size >= 1 and d_model >= 1

    # Lane-dense packing factor: pack * d_model is a multiple of 128.
    if d_model % _LANE == 0:
        pack = 1
    else:
        pack = _LANE // math.gcd(d_model, _LANE)
    w = pack * d_model  # slab lane width (multiple of 128)

    # Slab rows needed; row tile sized to the VMEM budget, multiple of 8.
    rows = _cdiv(max_size, pack)
    tr = max(_SUBLANE, min(rows, _TILE_BYTES // (w * 4)))
    tr = _cdiv(tr, _SUBLANE) * _SUBLANE
    grid = _cdiv(rows, tr)
    rows_padded = grid * tr  # padded rows are valid positions >= max_size

    # Column-only terms, precomputed once on host in f64, stored as (1, W) f32.
    lane = np.arange(w)
    feat = lane % d_model
    div = np.exp(-(feat - (feat % 2)).astype(np.float64)
                 * (math.log(10000.0) / d_model))
    off = (lane // d_model).astype(np.float64) * div \
        + (feat % 2).astype(np.float64) * (math.pi / 2.0)
    div_row = jnp.asarray(div, dtype=jnp.float32)[None, :]
    off_row = jnp.asarray(off, dtype=jnp.float32)[None, :]

    slab = pl.pallas_call(
        functools.partial(_pe_kernel, pack=pack),
        out_shape=jax.ShapeDtypeStruct((rows_padded, w), dtype),
        grid=(grid,),
        in_specs=[
            pl.BlockSpec((1, w), lambda i: (0, 0)),  # div_term row (reused)
            pl.BlockSpec((1, w), lambda i: (0, 0)),  # offset/phase row (reused)
        ],
        out_specs=pl.BlockSpec((tr, w), lambda i: (i, 0)),
        compiler_params=pltpu.CompilerParams(
            # Grid axis is embarrassingly parallel -> shards across the two
            # TensorCores on v7x; ~neutral (and harmless) on v5e/v6e.
            dimension_semantics=("parallel",)
        ),
    )(div_row, off_row)

    # Un-pack: (rows_padded, pack*d_model) -> (rows_padded*pack, d_model),
    # then drop the padding positions.
    return slab.reshape(rows_padded * pack, d_model)[:max_size, :]


class PositionalEncoding:
    """JAX/Pallas port of the PyTorch PositionalEncoding module."""

    def __init__(self, d_model: int, max_size: int, dtype=jnp.float32):
        self.d_model = d_model
        self.max_size = max_size
        # Parameter-free; table computed deterministically on device.
        # dtype=jnp.bfloat16 is supported if the consumer wants bf16 tables.
        self.encoding = build_encoding(max_size, d_model, dtype=dtype)

    def __call__(self, x: jax.Array) -> jax.Array:
        # x: (batch, seq_len) -- only seq_len (a static shape) is used.
        _, seq_len = x.shape
        return self.encoding[:seq_len, :]


def _reference_encoding(max_size: int, d_model: int) -> jnp.ndarray:
    # Pure-JAX transcription of the PyTorch __init__ math (even d_model).
    pos = jnp.arange(max_size, dtype=jnp.float32)[:, None]
    _2i = jnp.arange(0, d_model, 2, dtype=jnp.float32)
    div_term = jnp.exp(_2i * -(math.log(10000.0) / d_model))
    enc = jnp.zeros((max_size, d_model), dtype=jnp.float32)
    enc = enc.at[:, 0::2].set(jnp.sin(pos * div_term))
    enc = enc.at[:, 1::2].set(jnp.cos(pos * div_term))
    return enc


if __name__ == "__main__":
    d_model = 32
    max_size = 64
    batch, seq_len = 2, 8

    key = jax.random.PRNGKey(0)
    # x is only inspected for its shape (token ids, say).
    x = jax.random.randint(key, (batch, seq_len), 0, 100)

    module = PositionalEncoding(d_model=d_model, max_size=max_size)
    out = module(x)
    out = jax.block_until_ready(out)

    # Sanity checks against a pure-JAX reference of the PyTorch math.
    ref_full = _reference_encoding(max_size, d_model)
    assert out.shape == (seq_len, d_model)
    assert out.dtype == jnp.float32
    assert jnp.allclose(out, ref_full[:seq_len, :], atol=5e-5, rtol=1e-5)
    assert jnp.allclose(module.encoding, ref_full, atol=5e-5, rtol=1e-5)

    # Exercise the padded / non-divisible path (max_size not a multiple of the
    # packing factor or row tile).
    enc2 = jax.block_until_ready(build_encoding(200, 64))
    ref2 = _reference_encoding(200, 64)
    assert enc2.shape == (200, 64)
    assert jnp.allclose(enc2, ref2, atol=5e-5, rtol=1e-5)

    print("KERNEL_OK")
</pallas_src>

<mosaic_0001>
module attributes {stable_mosaic.version = 11 : i64} {
  func.func @_pe_kernel(%arg0: i32, %arg1: memref<1x128xf32, #tpu.memory_space<vmem>>, %arg2: memref<1x128xf32, #tpu.memory_space<vmem>>, %arg3: memref<16x128xf32, #tpu.memory_space<vmem>>) attributes {dimension_semantics = [#tpu.dimension_semantics<parallel>], iteration_bounds = array<i64: 1>, scalar_prefetch = 0 : i64, scratch_operands = 0 : i64, tpu.core_type = #tpu.core_type<tc>, window_params = [{pipeline_mode = #tpu.pipeline_mode<synchronous>, transform_indices = @transform_0, window_bounds = array<i64: 1, 128>}, {pipeline_mode = #tpu.pipeline_mode<synchronous>, transform_indices = @transform_1, window_bounds = array<i64: 1, 128>}, {transform_indices = @transform_2, window_bounds = array<i64: 16, 128>}]} {
    %c16_i32 = arith.constant 16 : i32
    %0 = arith.muli %arg0, %c16_i32 : i32
    %1 = tpu.iota {dimensions = array<i32: 0>} : vector<16x128xi32>
    %2 = vector.broadcast %0 : i32 to vector<16x128xi32>
    %3 = arith.addi %2, %1 : vector<16x128xi32>
    %c4_i32 = arith.constant 4 : i32
    %4 = vector.broadcast %c4_i32 : i32 to vector<16x128xi32>
    %5 = arith.muli %3, %4 : vector<16x128xi32>
    %6 = arith.sitofp %5 : vector<16x128xi32> to vector<16x128xf32>
    %c0 = arith.constant 0 : index
    %c0_0 = arith.constant 0 : index
    %7 = vector.load %arg1[%c0, %c0_0] : memref<1x128xf32, #tpu.memory_space<vmem>>, vector<1x128xf32>
    %8 = vector.broadcast %7 : vector<1x128xf32> to vector<16x128xf32>
    %9 = arith.mulf %6, %8 : vector<16x128xf32>
    %c0_1 = arith.constant 0 : index
    %c0_2 = arith.constant 0 : index
    %10 = vector.load %arg2[%c0_1, %c0_2] : memref<1x128xf32, #tpu.memory_space<vmem>>, vector<1x128xf32>
    %11 = vector.broadcast %10 : vector<1x128xf32> to vector<16x128xf32>
    %12 = arith.addf %9, %11 : vector<16x128xf32>
    %13 = math.sin %12 : vector<16x128xf32>
    %c0_3 = arith.constant 0 : index
    %c0_4 = arith.constant 0 : index
    %14 = vector.load %arg3[%c0_3, %c0_4] : memref<16x128xf32, #tpu.memory_space<vmem>>, vector<16x128xf32>
    tpu.vector_store %arg3[%c0_3, %c0_4], %13 {strides = array<i32>} : memref<16x128xf32, #tpu.memory_space<vmem>>, vector<16x128xf32>,
    return
  }
  func.func @transform_0(%arg0: i32) -> (i32, i32) {
    %c0_i32 = arith.constant 0 : i32
    %c0_i32_0 = arith.constant 0 : i32
    %c0_i32_1 = arith.constant 0 : i32
    return %c0_i32, %c0_i32_0 : i32, i32
  }
  func.func @transform_1(%arg0: i32) -> (i32, i32) {
    %c0_i32 = arith.constant 0 : i32
    %c0_i32_0 = arith.constant 0 : i32
    %c0_i32_1 = arith.constant 0 : i32
    return %c0_i32, %c0_i32_0 : i32, i32
  }
  func.func @transform_2(%arg0: i32) -> (i32, i32) {
    %c0_i32 = arith.constant 0 : i32
    %c0_i32_0 = arith.constant 0 : i32
    return %arg0, %c0_i32 : i32, i32
  }
}

</mosaic_0001>

<bundles_post_ra>
// kernel: tpu_custom_call.1
= control target key start
LH: loop header
LB: loop body
LE: loop exit
PB: predicated region body
PF: predicated region fallthrough
CT: control target
= control target key end

     0   :  { %7 = vsyncpa [#allocation3], 0  ;;  %s470_s0 = inlined_call_operand.hbm [shape: f32[1,128], index: 0, kind: input, shape index: {}]   ;;  %s471_s1 = inlined_call_operand.vmem [shape: f32[1,128], index: 1, kind: input, shape index: {}]   ;;  %s472_s2 = inlined_call_operand.hbm [shape: f32[16,128], index: 2, kind: output, shape index: {}]  }
   0x1   :  { %8 = vsyncpa [#allocation4], 0  ;;  %s360_s9 = smov [#allocation2]  }
   0x2   :  { %s15_s10 = sshll.u32 %s360_s9, 4  ;;  %s16_s10 = int_to_ptr.vmem [resolvable:$true] %s15_s10 }
   0x3   :  { %s324_s11 = scalar_lea.vmem %s16_s10, 16  ;;  %s328_s12 = scalar_lea.vmem %s16_s10, 32 }
   0x4   :  { %p325_p0 = scmp.ne.s32.totalorder %s16_s10, %s324_s11  ;;  %p329_p1 = scmp.lt.s32.totalorder %s16_s10, %s16_s10 }
   0x5   :  { %p330_p2 = scmp.lt.s32.totalorder %s328_s12, %s324_s11 }
   0x7   :  { %p331_p3 = por %p330_p2, %p329_p1 }
   0x9   :  { %p332_p4 = pnand %p331_p3, %p325_p0 }
   0xb   :  { %335 = shalt.err (!%p332_p4)
}
   0xc   :  { %18 = dma.hbm_to_vmem [thread:$0]  %s470_s0, 16, %s16_s10, [#allocation3]  }
   0xd   :  { %356 = dma.done.wait [#allocation3], 16  }
   0xe   :  { %357 = vsyncadd [#allocation3], 4294967280  ;;  %v25_v0 = vlaneseq  ;;  %v280_v6 = vld [vmem:[#allocation2] ss:$0 sm:$0xff]  ;;  %v361_v32 = vmov 683565275  }
   0xf   :  { %v281_v7 = vld [vmem:[%s471_s1] ss:$0 sm:$0xff]  ;;  %v362_v34 = vmov 2475754826   ;;  %v363_v36 = vmov 2131351028  }
  0x10   :  { %v26_v1 = vshrl.u32 %v25_v0, 7  ;;  %v364_v38 = vmov 2102212464   ;;  %v365_v40 = vmov 920167782   ;;  %s367_s0 = smov [#allocation5]  }
  0x11   :  { %v366_v47 = vmov 1326507024   ;;  %s268_s1 = sshll.u32 %s367_s0, 4  ;;  %s269_s1 = int_to_ptr.vmem [resolvable:$true] %s268_s1 }
  0x12   :  { %v31_v2 = vmul.u32 4, %v26_v1  ;;  %v27_v3 = vadd.s32 8, %v26_v1  ;;  %s336_s17 = scalar_lea.vmem %s269_s1, 256  ;;  %p341_p6 = scmp.lt.s32.totalorder %s269_s1, %s269_s1 }
  0x13   :  { %p337_p5 = scmp.ne.s32.totalorder %s269_s1, %s336_s17  ;;  %p342_p7 = scmp.lt.s32.totalorder %s336_s17, %s336_s17 }
  0x14   :  { %v33_v4 = vcvt.s32.f32 %v31_v2  ;;  %v32_v5 = vmul.u32 4, %v27_v3 }
  0x15   :  { %p343_p8 = por %p342_p7, %p341_p6 }
  0x16   :  { %v42_v8 = vmul.f32 %v280_v6, %v33_v4  ;;  %v34_v9 = vcvt.s32.f32 %v32_v5 }
  0x17   :  { %p344_p9 = pnand %p343_p8, %p337_p5 }
  0x18   :  { %v391_v10 = vadd.f32 %v281_v7, %v42_v8  ;;  %v43_v11 = vmul.f32 %v280_v6, %v34_v9 }
  0x1a   :  { %v53_v12 = vand.u32 2147483647, %v391_v10  ;;  %v56_v13 = vand.u32 2139095040, %v391_v10  ;;  %v395_v14 = vadd.f32 %v281_v7, %v43_v11  ;;  %vm55_vm14 = vcmp.lt.s32.totalorder %v391_v10, 0 }
  0x1c   :  { %v57_v15 = vshrl.u32 %v56_v13, 23  ;;  %v60_v16 = vand.u32 8388607, %v53_v12  ;;  %v157_v17 = vand.u32 2147483647, %v395_v14  ;;  %v160_v18 = vand.u32 2139095040, %v395_v14 }
  0x1d   :  { %vm54_vm15 = vcmp.le.f32.partialorder %v53_v12, 0.7853982 }
  0x1e   :  { %v282_v19 = vadd.s32 4294967169, %v57_v15  ;;  %v161_v20 = vshrl.u32 %v160_v18, 23  ;;  %v61_v22 = vor.u32 8388608, %v60_v16  ;;  %v403_v24 = vand.u32 8388607, %v157_v17 }
  0x20   :  { %v63_v21 = vadd.s32 1, %v282_v19  ;;  %v286_v23 = vadd.s32 4294967169, %v161_v20  ;;  %v405_v29 = vshll.u32 %v61_v22, 8  ;;  %v165_v30 = vor.u32 8388608, %v403_v24 }
  0x22   :  { %vm64_vm0 = vcmp.gt.s32.totalorder %v63_v21, 0  ;;  %v167_v26 = vadd.s32 1, %v286_v23 }
  0x23   :  { %v65_v25 = vsel %vm64_vm0, %v63_v21, 0  ;;  %vm159_vm0 = vcmp.lt.s32.totalorder %v395_v14, 0 }
  0x24   :  { %v66_v27 = vshrl.u32 %v65_v25, 5  ;;  %v67_v28 = vand.u32 31, %v65_v25  ;;  %vm168_vm1 = vcmp.gt.s32.totalorder %v167_v26, 0 }
  0x25   :  { %v169_v52 = vsel %vm168_vm1, %v167_v26, 0  ;;  %vm456_vm1 = vcmp.le.f32.partialorder %v157_v17, 0.7853982 }
  0x26   :  { %v68_v31 = vsub.s32 32, %v67_v28  ;;  %v70_v33 = vshll.u32 %v361_v32, %v67_v28  ;;  %v73_v35 = vshll.u32 %v362_v34, %v67_v28  ;;  %v76_v37 = vshll.u32 %v363_v36, %v67_v28 }
  0x27   :  { %v79_v39 = vshll.u32 %v364_v38, %v67_v28  ;;  %v82_v41 = vshll.u32 %v365_v40, %v67_v28  ;;  %vm85_vm2 = vcmp.lt.s32.totalorder %v66_v27, 1  ;;  %vm86_vm3 = vcmp.lt.s32.totalorder %v66_v27, 2 }
  0x28   :  { %v69_v42 = vshrl.u32 %v361_v32, %v68_v31  ;;  %v71_v43 = vshrl.u32 %v362_v34, %v68_v31  ;;  %v74_v44 = vshrl.u32 %v363_v36, %v68_v31  ;;  %v77_v45 = vshrl.u32 %v364_v38, %v68_v31 }
  0x29   :  { %v80_v46 = vshrl.u32 %v365_v40, %v68_v31  ;;  %v83_v48 = vshrl.u32 %v366_v47, %v68_v31  ;;  %vm87_vm4 = vcmp.lt.s32.totalorder %v66_v27, 3  ;;  %vm88_vm5 = vcmp.lt.s32.totalorder %v66_v27, 4 }
  0x2a   :  { %v72_v49 = vor.u32 %v71_v43, %v70_v33  ;;  %v75_v50 = vor.u32 %v74_v44, %v73_v35  ;;  %v78_v51 = vor.u32 %v77_v45, %v76_v37  ;;  %v170_v55 = vshrl.u32 %v169_v52, 5 }
  0x2b   :  { %v81_v53 = vor.u32 %v80_v46, %v79_v39  ;;  %v84_v54 = vor.u32 %v83_v48, %v82_v41  ;;  %v171_v56 = vand.u32 31, %v169_v52 }
  0x2c   :  { %v89_v57 = vsel %vm85_vm2, %v69_v42, %v72_v49  ;;  %v90_v58 = vsel %vm88_vm5, %v78_v51, 2102212464  ;;  %v93_v59 = vsel %vm85_vm2, %v72_v49, %v75_v50  ;;  %v97_v60 = vsel %vm85_vm2, %v75_v50, %v78_v51 }
  0x2d   :  { %v91_v61 = vsel %vm87_vm4, %v75_v50, %v90_v58  ;;  %v94_v62 = vsel %vm88_vm5, %v81_v53, 920167782  ;;  %v98_v63 = vsel %vm88_vm5, %v84_v54, 1326507024  ;;  %v172_v0 = vsub.s32 32, %v171_v56 }
  0x2e   :  { %v92_v1 = vsel %vm86_vm3, %v89_v57, %v91_v61  ;;  %v95_v2 = vsel %vm87_vm4, %v78_v51, %v94_v62  ;;  %v99_v3 = vsel %vm87_vm4, %v81_v53, %v98_v63  ;;  %v174_v4 = vshll.u32 %v361_v32, %v171_v56 }
  0x2f   :  { %v96_v5 = vsel %vm86_vm3, %v93_v59, %v95_v2  ;;  %v100_v6 = vsel %vm86_vm3, %v97_v60, %v99_v3  ;;  %v108_v7 = vmul.u32 %v405_v29, %v92_v1  ;;  %v173_v8 = vshrl.u32 %v361_v32, %v172_v0 }
  0x30   :  { %v420_v9 = vmul.u32.u64.low %v405_v29, %v100_v6  ;;  %v421_v11 = vmul.u32.u64.high %v405_v29, %v100_v6, %v420_v9  ;;  %v424_v13 = vmul.u32.u64.low %v405_v29, %v96_v5  ;;  %v425_v15 = vmul.u32.u64.high %v405_v29, %v96_v5, %v424_v13 }
  0x31   :  { %v175_v16 = vshrl.u32 %v362_v34, %v172_v0  ;;  %v177_v18 = vshll.u32 %v362_v34, %v171_v56  ;;  %v178_v19 = vshrl.u32 %v363_v36, %v172_v0  ;;  %v180_v20 = vshll.u32 %v363_v36, %v171_v56 }
  0x32   :  { %v181_v21 = vshrl.u32 %v364_v38, %v172_v0  ;;  %v183_v22 = vshll.u32 %v364_v38, %v171_v56  ;;  %v184_v23 = vshrl.u32 %v365_v40, %v172_v0  ;;  %v186_v25 = vshll.u32 %v365_v40, %v171_v56 }
  0x33   :  { %v176_v26 = vor.u32 %v175_v16, %v174_v4  ;;  %v179_v27 = vor.u32 %v178_v19, %v177_v18  ;;  %v187_v28 = vshrl.u32 %v366_v47, %v172_v0  ;;  %vm189_vm6 = vcmp.lt.s32.totalorder %v170_v55, 1 }
  0x34   :  { %vm110_vm7 = vc.u32 %v421_v11, %v424_v13  ;;  %v111_v31 = vadd.s32 1, %v425_v15  ;;  %v182_v32 = vor.u32 %v181_v21, %v180_v20  ;;  %v205_v29 = vshll.u32 %v165_v30, 8 }
  0x35   :  { %v185_v33 = vor.u32 %v184_v23, %v183_v22  ;;  %v188_v34 = vor.u32 %v187_v28, %v186_v25  ;;  %vm190_vm8 = vcmp.lt.s32.totalorder %v170_v55, 2  ;;  %vm191_vm9 = vcmp.lt.s32.totalorder %v170_v55, 3 }
  0x36   :  { %v112_v35 = vsel %vm110_vm7, %v111_v31, %v425_v15  ;;  %vm192_vm10 = vcmp.lt.s32.totalorder %v170_v55, 4  ;;  %v193_v36 = vsel %vm189_vm6, %v173_v8, %v176_v26  ;;  %v197_v37 = vsel %vm189_vm6, %v176_v26, %v179_v27 }
  0x37   :  { %v113_v38 = vadd.s32 %v112_v35, %v108_v7  ;;  %v194_v39 = vsel %vm192_vm10, %v182_v32, 2102212464  ;;  %v198_v40 = vsel %vm192_vm10, %v185_v33, 920167782  ;;  %v201_v41 = vsel %vm189_vm6, %v179_v27, %v182_v32 }
  0x38   :  { %v195_v42 = vsel %vm191_vm9, %v179_v27, %v194_v39  ;;  %v199_v43 = vsel %vm191_vm9, %v182_v32, %v198_v40  ;;  %v202_v24 = vsel %vm192_vm10, %v188_v34, 1326507024  ;;  %v109_v2 = vadd.s32 %v424_v13, %v421_v11 }
  0x39   :  { %v114_v30 = vadd.s32 536870912, %v113_v38  ;;  %v200_v44 = vsel %vm190_vm8, %v197_v37, %v199_v43  ;;  %v203_v45 = vsel %vm191_vm9, %v185_v33, %v202_v24  ;;  %v196_v46 = vsel %vm190_vm8, %v193_v36, %v195_v42 }
  0x3a   :  { %v204_v47 = vsel %vm190_vm8, %v201_v41, %v203_v45  ;;  %v438_v48 = vmul.u32.u64.low %v205_v29, %v200_v44  ;;  %v439_v49 = vmul.u32.u64.high %v205_v29, %v200_v44, %v438_v48  ;;  %v212_v54 = vmul.u32 %v205_v29, %v196_v46 }
  0x3b   :  { %v115_v50 = vshrl.u32 %v114_v30, 30  ;;  %v441_v51 = vmul.u32.u64.low %v205_v29, %v204_v47  ;;  %v442_v52 = vmul.u32.u64.high %v205_v29, %v204_v47, %v441_v51  ;;  %vm145_vm5 = vweird.f32 %v391_v10 }
  0x3c   :  { %v215_v56 = vadd.s32 1, %v439_v49  ;;  %vm249_vm9 = vweird.f32 %v395_v14 }
  0x3d   :  { %v116_v53 = vshll.u32 %v115_v50, 30  ;;  %vm214_vm11 = vc.u32 %v442_v52, %v438_v48  ;;  %v213_v26 = vadd.s32 %v438_v48, %v442_v52  ;;  %v139_v27 = vsub.s32 4, %v115_v50 }
  0x3e   :  { %v216_v58 = vsel %vm214_vm11, %v215_v56, %v439_v49 }
  0x3f   :  { %v117_v57 = vsub.s32 %v113_v38, %v116_v53  ;;  %v217_v60 = vadd.s32 %v216_v58, %v212_v54  ;;  %v140_v36 = vsel %vm55_vm14, %v139_v27, %v115_v50 }
  0x40   :  { %v142_v42 = vsel %vm54_vm15, 0, %v140_v36 }
  0x41   :  { %v119_v59 = vsub.s32 0, %v117_v57  ;;  %v218_v61 = vadd.s32 536870912, %v217_v60  ;;  %v146_v24 = vadd.s32 3, %v142_v42 }
  0x43   :  { %v283_v55 = vmin.u32 %v119_v59, %v117_v57  ;;  %v219_v63 = vshrl.u32 %v218_v61, 30  ;;  %v147_v46 = vand.u32 3, %v146_v24 }
  0x45   :  { %v121_v62 = vclz %v283_v55  ;;  %v220_v1 = vshll.u32 %v219_v63, 30  ;;  %v243_v12 = vsub.s32 4, %v219_v63  ;;  %vm152_vm2 = vcmp.eq.s32.totalorder %v147_v46, 2 }
  0x46   :  { %vm149_vm3 = vcmp.eq.s32.totalorder %v147_v46, 0  ;;  %vm148_vm4 = vcmp.lt.s32.totalorder %v147_v46, 2 }
  0x47   :  { %v284_v0 = vadd.s32 4294967294, %v121_v62  ;;  %v221_v4 = vsub.s32 %v217_v60, %v220_v1  ;;  %v244_v48 = vsel %vm159_vm0, %v243_v12, %v219_v63 }
  0x48   :  { %v246_v51 = vsel %vm456_vm1, 0, %v244_v48 }
  0x49   :  { %vm285_vm12 = vcmp.lt.s32.totalorder %v284_v0, 0  ;;  %v223_v8 = vsub.s32 0, %v221_v4  ;;  %v250_v56 = vadd.s32 3, %v246_v51 }
  0x4a   :  { %v124_v3 = vsel %vm285_vm12, 0, %v284_v0 }
  0x4b   :  { %v125_v5 = vsub.s32 32, %v124_v3  ;;  %v126_v6 = vshll.u32 %v117_v57, %v124_v3  ;;  %v129_v7 = vsub.s32 4294967266, %v124_v3  ;;  %v287_v16 = vmin.u32 %v223_v8, %v221_v4 }
  0x4c   :  { %v251_v60 = vand.u32 3, %v250_v56 }
  0x4d   :  { %v127_v9 = vshrl.u32 %v109_v2, %v125_v5  ;;  %v130_v15 = vadd.s32 127, %v129_v7  ;;  %v225_v20 = vclz %v287_v16 }
  0x4e   :  { %vm256_vm6 = vcmp.eq.s32.totalorder %v251_v60, 2  ;;  %vm253_vm7 = vcmp.eq.s32.totalorder %v251_v60, 0  ;;  %vm252_vm8 = vcmp.lt.s32.totalorder %v251_v60, 2 }
  0x4f   :  { %v128_v18 = vor.u32 %v127_v9, %v126_v6  ;;  %v131_v19 = vshll.u32 %v130_v15, 23  ;;  %v288_v23 = vadd.s32 4294967294, %v225_v20 }
  0x51   :  { %v132_v21 = vor.u32 4788187, %v131_v19  ;;  %v135_v22 = vcvt.s32.f32 %v128_v18  ;;  %vm289_vm13 = vcmp.lt.s32.totalorder %v288_v23, 0 }
  0x52   :  { %v228_v13 = vsel %vm289_vm13, 0, %v288_v23 }
  0x53   :  { %v133_v25 = vand.u32 2147483647, %v132_v21  ;;  %v229_v28 = vsub.s32 32, %v228_v13  ;;  %v230_v31 = vshll.u32 %v221_v4, %v228_v13  ;;  %v233_v32 = vsub.s32 4294967266, %v228_v13 }
  0x55   :  { %v136_v11 = vmul.f32 %v135_v22, %v133_v25  ;;  %v231_v33 = vshrl.u32 %v213_v26, %v229_v28  ;;  %v234_v34 = vadd.s32 127, %v233_v32 }
  0x57   :  { %v137_v29 = vxor.u32 2147483648, %v136_v11  ;;  %v232_v38 = vor.u32 %v231_v33, %v230_v31  ;;  %v235_v39 = vshll.u32 %v234_v34, 23 }
  0x59   :  { %v138_v35 = vsel %vm55_vm14, %v137_v29, %v136_v11  ;;  %v236_v40 = vor.u32 4788187, %v235_v39  ;;  %v239_v41 = vcvt.s32.f32 %v232_v38 }
  0x5a   :  { %v141_v37 = vsel %vm54_vm15, %v391_v10, %v138_v35 }
  0x5b   :  { %308 = vcosq.f32 %v141_v37  ;;  %v237_v43 = vand.u32 2147483647, %v236_v40 }
  0x5c   :  { %310 = vsinq.f32 %v141_v37 }
  0x5d   :  { %v240_v30 = vmul.f32 %v239_v41, %v237_v43 }
  0x5f   :  { %v241_v45 = vxor.u32 2147483648, %v240_v30 }
  0x61   :  { %v242_v47 = vsel %vm159_vm0, %v241_v45, %v240_v30 }
  0x62   :  { %v245_v49 = vsel %vm456_vm1, %v395_v14, %v242_v47 }
  0x63   :  { %312 = vcosq.f32 %v245_v49 }
  0x64   :  { %314 = vsinq.f32 %v245_v49 }
  0x68   :  { %v309_v50 = vpop.eup %308 }
  0x69   :  { %v311_v52 = vpop.eup %310  ;;  %v153_v17 = vxor.u32 2147483648, %v309_v50 }
  0x6a   :  { %v150_v53 = vxor.u32 2147483648, %v311_v52 }
  0x6b   :  { %v154_v54 = vsel %vm152_vm2, %v153_v17, %v311_v52 }
  0x6c   :  { %v151_v57 = vsel %vm149_vm3, %v309_v50, %v150_v53 }
  0x6d   :  { %v155_v58 = vsel %vm148_vm4, %v151_v57, %v154_v54 }
  0x6e   :  { %v156_v59 = vsel %vm145_vm5, nan, %v155_v58 }
  0x6f   :  { %261 = vst [vmem:[#allocation5] sm:$0xff] %v156_v59 }
  0x70   :  { %v313_v55 = vpop.eup %312 }
  0x71   :  { %v315_v61 = vpop.eup %314  ;;  %v257_v62 = vxor.u32 2147483648, %v313_v55 }
  0x72   :  { %v254_v63 = vxor.u32 2147483648, %v315_v61 }
  0x73   :  { %v258_v0 = vsel %vm256_vm6, %v257_v62, %v315_v61 }
  0x74   :  { %v255_v10 = vsel %vm253_vm7, %v313_v55, %v254_v63 }
  0x75   :  { %v259_v1 = vsel %vm252_vm8, %v255_v10, %v258_v0 }
  0x76   :  { %v260_v2 = vsel %vm249_vm9, nan, %v259_v1 }
  0x77   :  { %262 = vst [vmem:[#allocation5 + $0x8] sm:$0xff] %v260_v2 }
  0x78   :  { %347 = shalt.err (!%p344_p9)
}
  0x79   :  { %s368_s18 = smov 128   ;;  %s369_s19 = smov 8  }
  0x7a   :  { %274 = dma.vmem_to_hbm [thread:$0]  %s269_s1, 256, %s472_s2, [#allocation4], %s368_s18, %s368_s18, %s369_s19  }
  0x7b   :  { %358 = dma.done.wait [#allocation4], 256  }
  0x7c   :  { %359 = vsyncadd [#allocation4], 4294967040 }
  0x7d   :  { %278 = vsyncpa [#allocation3], 1 }
  0x7e   :  { %279 = vsyncpa [#allocation4], 1 }

</bundles_post_ra>
